<compile_context>
chip_gen: v6e
topology: v6e:2x2x1
jax: 0.10.0
libtpu: 0.0.40
codegen_flags: <defaults>
</compile_context>

<pallas_src>
import numpy as np
import jax
import jax.numpy as jnp
from jax.experimental import pallas as pl
from jax.experimental.pallas import tpu as pltpu


# SMPL kinematic tree (parent of each of the 24 joints; -1 = root, never indexed).
SMPL_PARENTS = (-1, 0, 0, 0, 1, 2, 3, 4, 5, 6, 7, 8, 9, 9, 9, 12,
                13, 14, 16, 17, 18, 19, 20, 21)


def _round_up(x, m):
    return ((x + m - 1) // m) * m


def _normalize(v, axis=-1, eps=1e-8):
    return v / jnp.maximum(jnp.linalg.norm(v, axis=axis, keepdims=True), eps)


def batch_rodrigues(theta):
    """Axis-angle (M, 3) -> rotation matrices (M, 3, 3)."""
    angle = jnp.linalg.norm(theta + 1e-8, axis=1, keepdims=True)          # (M, 1)
    r = theta / angle                                                     # (M, 3)
    cos = jnp.cos(angle)[:, :, None]                                      # (M, 1, 1)
    sin = jnp.sin(angle)[:, :, None]
    rx, ry, rz = r[:, 0], r[:, 1], r[:, 2]
    zeros = jnp.zeros_like(rx)
    K = jnp.stack([zeros, -rz, ry,
                   rz, zeros, -rx,
                   -ry, rx, zeros], axis=1).reshape(-1, 3, 3)
    eye = jnp.eye(3, dtype=theta.dtype)[None]
    outer = r[:, :, None] * r[:, None, :]
    return cos * eye + (1.0 - cos) * outer + sin * K


def batch_global_rigid_transformation(Rs, Js, parents, rotate_base=False):
    """Forward kinematics. Rs (B,24,3,3), Js (B,24,3) -> (new_J (B,24,3), A (B,24,4,4))."""
    B, n_j = Rs.shape[0], Rs.shape[1]
    dt = Rs.dtype
    if rotate_base:
        rot_x = jnp.array([[1, 0, 0], [0, -1, 0], [0, 0, -1]], dtype=dt)
        root_rotation = Rs[:, 0] @ rot_x
    else:
        root_rotation = Rs[:, 0]
    Js_ = Js[..., None]                                                   # (B, 24, 3, 1)

    def make_A(R, t):                                                     # (B,3,3),(B,3,1)->(B,4,4)
        R_homo = jnp.concatenate([R, jnp.zeros((B, 1, 3), dt)], axis=1)
        t_homo = jnp.concatenate([t, jnp.ones((B, 1, 1), dt)], axis=1)
        return jnp.concatenate([R_homo, t_homo], axis=2)

    results = [make_A(root_rotation, Js_[:, 0])]
    for i in range(1, n_j):
        j_here = Js_[:, i] - Js_[:, parents[i]]
        results.append(results[parents[i]] @ make_A(Rs[:, i], j_here))
    results = jnp.stack(results, axis=1)                                  # (B, 24, 4, 4)

    new_J = results[:, :, :3, 3]
    Js_w0 = jnp.concatenate([Js_, jnp.zeros((B, n_j, 1, 1), dt)], axis=2)
    init_bone = results @ Js_w0                                           # (B, 24, 4, 1)
    init_bone = jnp.pad(init_bone, ((0, 0), (0, 0), (0, 0), (3, 0)))      # last column only
    return new_J, results - init_bone


# ---------------------------------------------------------------------------
# Pallas kernel: per-point linear blend skinning (points along the lane axis)
#   T[e, p]  = sum_k A16[b(p), k, e] * W[k, p]          e = 4*r + c (row-major)
#   po[r, p] = sum_c T[4r+c, p] * ph[c, p]
# ---------------------------------------------------------------------------
def _skin_kernel(bid_ref, ws_ref, ph_ref, at_ref, out_ref):
    """One point-tile.

    ws_ref  (K, TP)  bf16  skinning weights, points along lanes
    ph_ref  (4, TP)  f32   homogeneous points [x, y, z, 1], points along lanes
    at_ref  (16, K)  f32   A[batch(tile)]^T:  at[e, k] = A[b, k].reshape(16)[e]
    out_ref (20, TP) f32   rows 0..15 = T (row-major 4x4), rows 16..19 = T @ ph
    """
    del bid_ref  # only consumed by the index_maps
    W = ws_ref[...].astype(jnp.float32)          # (K, TP) -- bf16 is storage only
    at = at_ref[...]                             # (16, K)
    K = at.shape[1]

    # Blend: K broadcast-FMAs on (16, TP) values; 4 independent accumulators
    # expose ILP across VALU slots (v5e has no f32 FMA fusion slack).
    n4 = (K // 4) * 4
    acc = [at[:, j:j + 1] * W[j:j + 1, :] for j in range(4)]
    for k in range(4, n4, 4):
        for j in range(4):
            acc[j] = acc[j] + at[:, k + j:k + j + 1] * W[k + j:k + j + 1, :]
    for k in range(n4, K):                        # remainder joints (K % 4 != 0)
        acc[0] = acc[0] + at[:, k:k + 1] * W[k:k + 1, :]
    T = (acc[0] + acc[1]) + (acc[2] + acc[3])     # (16, TP)

    # Apply the per-point row-major 4x4 to the homogeneous point.
    ph = ph_ref[...]                              # (4, TP)
    rows = []
    for r in range(4):
        rows.append(T[4 * r + 0:4 * r + 1, :] * ph[0:1, :]
                    + T[4 * r + 1:4 * r + 2, :] * ph[1:2, :]
                    + T[4 * r + 2:4 * r + 3, :] * ph[2:3, :]
                    + T[4 * r + 3:4 * r + 4, :] * ph[3:4, :])

    out_ref[0:16, :] = T                          # lane-dense stores
    out_ref[16:20, :] = jnp.concatenate(rows, axis=0)


def skin_points_pallas(ps, ws, A, splitl, *, tile_p=None):
    """Blend-skin points.  ps (N,3), ws (N,K), A (B,K,4,4); splitl = host-side
    per-batch point counts (Python ints, like torch .split()).
    Returns (ps_out (N,3), T (N,4,4))."""
    N = int(ps.shape[0])
    B, K = int(A.shape[0]), int(A.shape[1])
    assert ws.shape == (N, K) and A.shape == (B, K, 4, 4)
    assert len(splitl) == B and sum(splitl) == N
    assert K >= 4

    if N == 0:
        return jnp.zeros((0, 3), jnp.float32), jnp.zeros((0, 4, 4), jnp.float32)

    # Tile size: lane-dense (multiple of 128); grow toward 2048 for big batches
    # while keeping per-batch padding waste small. VMEM at 2048 lanes is <1 MB.
    p_max = max(max(splitl), 1)
    if tile_p is None:
        tile_p = 128
        while tile_p < 2048 and tile_p * 8 <= p_max:
            tile_p *= 2
    assert tile_p % 128 == 0

    # Host-side layout plan (splitl are static host ints): each batch's points
    # are padded only to a multiple of tile_p and concatenated into one slab.
    pad_sizes = [_round_up(n, tile_p) if n > 0 else 0 for n in splitl]
    starts = np.cumsum([0] + pad_sizes)
    N_pad = int(starts[-1])
    num_tiles = N_pad // tile_p

    src_idx = np.full((N_pad,), N, dtype=np.int32)       # N = sentinel zero row
    dst_idx = np.zeros((N,), dtype=np.int32)
    bid_np = np.zeros((num_tiles,), dtype=np.int32)      # per-tile batch id
    off = 0
    for b, n in enumerate(splitl):
        if n > 0:
            s = int(starts[b])
            src_idx[s:s + n] = np.arange(off, off + n, dtype=np.int32)
            dst_idx[off:off + n] = np.arange(s, s + n, dtype=np.int32)
            bid_np[s // tile_p: int(starts[b + 1]) // tile_p] = b
        off += n
    src_idx = jnp.asarray(src_idx)
    dst_idx = jnp.asarray(dst_idx)
    bid = jnp.asarray(bid_np)

    # Device-side packing: one gather per array, points along the last (lane) axis.
    ws_ext = jnp.concatenate(
        [ws.astype(jnp.bfloat16), jnp.zeros((1, K), jnp.bfloat16)], axis=0)
    ph = jnp.concatenate(
        [ps.astype(jnp.float32), jnp.ones((N, 1), jnp.float32)], axis=-1)
    ph_ext = jnp.concatenate([ph, jnp.zeros((1, 4), jnp.float32)], axis=0)
    ws_t = jnp.take(ws_ext, src_idx, axis=0).T                      # (K, N_pad)  bf16
    ph_t = jnp.take(ph_ext, src_idx, axis=0).T                      # (4, N_pad)  f32
    A_t = jnp.transpose(A.reshape(B, K, 16).astype(jnp.float32),
                        (0, 2, 1))                                  # (B, 16, K)

    flops = N_pad * (2 * K * 16 + 2 * 16)
    bytes_accessed = (N_pad * K * 2 + N_pad * 4 * 4 + N_pad * 20 * 4
                      + num_tiles * 16 * K * 4)

    out = pl.pallas_call(
        _skin_kernel,
        out_shape=jax.ShapeDtypeStruct((20, N_pad), jnp.float32),
        grid_spec=pltpu.PrefetchScalarGridSpec(
            num_scalar_prefetch=1,                                  # bid -> SMEM
            grid=(num_tiles,),
            in_specs=[
                pl.BlockSpec((K, tile_p), lambda t, b_ids: (0, t)),          # weights
                pl.BlockSpec((4, tile_p), lambda t, b_ids: (0, t)),          # points
                pl.BlockSpec((None, 16, K), lambda t, b_ids: (b_ids[t], 0, 0)),  # A[b]^T
            ],
            out_specs=pl.BlockSpec((20, tile_p), lambda t, b_ids: (0, t)),   # fused T|po
        ),
        compiler_params=pltpu.CompilerParams(
            dimension_semantics=("parallel",)),
        cost_estimate=pl.CostEstimate(flops=flops, transcendentals=0,
                                      bytes_accessed=bytes_accessed),
    )(bid, ws_t, ph_t, A_t)

    # Unpack back to the flat (N, ...) layout (layout plumbing outside the kernel).
    T = jnp.take(out[0:16, :], dst_idx, axis=1).T.reshape(N, 4, 4)
    po = jnp.take(out[16:20, :], dst_idx, axis=1).T                 # (N, 4)
    return po[:, :3], T


class SkinDeformNetJAX:
    """JAX / Pallas port of SkinDeformNet.forward (SMPL-style LBS deform)."""

    def __init__(self, parents=SMPL_PARENTS):
        self.parents = parents

    def skeleton(self, shapes, require_body=False):
        # TODO(synk): smpl.skeleton needs the SMPL joint regressor / shape blendshapes (external model data).
        raise NotImplementedError("smpl.skeleton requires SMPL model data")

    def forward(self, ps, JsorShapes, ws, poses, batch,
                check_rotation=True, is_Rotation=False):
        batch_num = poses.shape[0]
        assert batch_num == JsorShapes.shape[0]
        n_j = len(self.parents)

        # --- joints ---
        if JsorShapes.size == batch_num * 10:
            Js = self.skeleton(JsorShapes)              # TODO(synk): see skeleton()
        else:
            Js = JsorShapes.reshape(batch_num, n_j, 3)

        # --- pose -> per-joint relative transforms A (B, 24, 4, 4) ---
        if poses.size == batch_num * n_j * 3:
            Rs = batch_rodrigues(poses.reshape(-1, 3)).reshape(batch_num, n_j, 3, 3)
            Js_transformed, A = batch_global_rigid_transformation(
                Rs, Js, self.parents, rotate_base=False)
        elif poses.size == batch_num * n_j * 9:
            if not is_Rotation:
                ms = poses.reshape(-1, 3, 3)
                b1 = _normalize(ms[:, :, 0], axis=1)
                dot_prod = jnp.sum(b1 * ms[:, :, 1], axis=1, keepdims=True)
                b2 = _normalize(ms[:, :, 1] - dot_prod * b1, axis=-1)
                b3 = jnp.cross(b1, b2, axis=1)
                Rs = jnp.stack([b1, b2, b3], axis=-1).reshape(batch_num, n_j, 3, 3)
            else:
                Rs = poses.reshape(batch_num, n_j, 3, 3)
            Js_transformed, A = batch_global_rigid_transformation(
                Rs, Js, self.parents, rotate_base=False)
        elif poses.size == batch_num * n_j * 16:
            A = poses.reshape(batch_num, n_j, 4, 4)
            Js_transformed = None
            Rs = None
        else:
            raise ValueError("unsupported pose format")

        # Per-batch point counts: host-side ints (like torch_scatter(...).cpu());
        # assumes `batch` is sorted / grouped.  Not jit-traceable by design.
        batch_np = np.asarray(batch).reshape(-1)
        assert np.all(np.diff(batch_np) >= 0), "points must be grouped by batch"
        splitl = np.bincount(batch_np, minlength=batch_num).astype(np.int32).tolist()

        ps3, T = skin_points_pallas(ps, ws, A, splitl)
        return ps3, T, Rs, Js_transformed


if __name__ == "__main__":
    key = jax.random.PRNGKey(0)
    B, n_joints = 2, 24
    splitl = [56, 72]                          # ragged points per batch element
    N = sum(splitl)

    k1, k2, k3, k4 = jax.random.split(key, 4)
    ps = jax.random.normal(k1, (N, 3), jnp.float32)
    ws = jax.nn.softmax(jax.random.normal(k2, (N, n_joints), jnp.float32), axis=-1)
    Js = jax.random.normal(k3, (B, n_joints, 3), jnp.float32) * 0.2
    poses = jax.random.normal(k4, (B, n_joints, 3), jnp.float32) * 0.3     # axis-angle
    batch = np.concatenate([np.full((n,), b, np.int32) for b, n in enumerate(splitl)])

    net = SkinDeformNetJAX()
    ps3, T, Rs, Js_transformed = net.forward(ps, Js, ws, poses, batch)
    ps3, T = jax.block_until_ready((ps3, T))

    # Pure-JAX reference for the Pallas-skinned part (same A, same bf16-quantized
    # weights the kernel stores in HBM; all accumulation in f32 on both sides).
    Rs_ref = batch_rodrigues(poses.reshape(-1, 3)).reshape(B, n_joints, 3, 3)
    _, A_ref = batch_global_rigid_transformation(Rs_ref, Js, SMPL_PARENTS)
    ws_q = ws.astype(jnp.bfloat16).astype(jnp.float32)
    A_pp = A_ref.reshape(B, n_joints, 16)[batch]                           # (N, 24, 16)
    T_ref = jnp.sum(ws_q[:, :, None] * A_pp, axis=1).reshape(N, 4, 4)
    ph = jnp.concatenate([ps, jnp.ones((N, 1), jnp.float32)], axis=-1)
    p_ref = jnp.sum(T_ref * ph[:, None, :], axis=-1)[:, :3]

    assert ps3.shape == (N, 3) and T.shape == (N, 4, 4)
    assert Rs is not None and Js_transformed.shape == (B, n_joints, 3)
    assert jnp.allclose(T, T_ref, atol=1e-4, rtol=1e-4)
    assert jnp.allclose(ps3, p_ref, atol=1e-4, rtol=1e-4)
    print("KERNEL_OK")
</pallas_src>

<mosaic_0001>
module attributes {stable_mosaic.version = 11 : i64} {
  func.func @_skin_kernel(%arg0: i32, %arg1: memref<2xi32, #tpu.memory_space<smem>>, %arg2: memref<24x128xbf16, #tpu.memory_space<vmem>>, %arg3: memref<4x128xf32, #tpu.memory_space<vmem>>, %arg4: memref<1x16x24xf32, #tpu.memory_space<vmem>>, %arg5: memref<20x128xf32, #tpu.memory_space<vmem>>) attributes {dimension_semantics = [#tpu.dimension_semantics<parallel>], iteration_bounds = array<i64: 2>, scalar_prefetch = 1 : i64, scratch_operands = 0 : i64, tpu.core_type = #tpu.core_type<tc>, window_params = [{transform_indices = @transform_0, window_bounds = array<i64: 24, 128>}, {transform_indices = @transform_1, window_bounds = array<i64: 4, 128>}, {transform_indices = @transform_2, window_bounds = array<i64: 1, 16, 24>}, {transform_indices = @transform_3, window_bounds = array<i64: 20, 128>}]} {
    %c0 = arith.constant 0 : index
    %c0_0 = arith.constant 0 : index
    %0 = vector.load %arg2[%c0, %c0_0] : memref<24x128xbf16, #tpu.memory_space<vmem>>, vector<24x128xbf16>
    %1 = arith.extf %0 : vector<24x128xbf16> to vector<24x128xf32>
    %c0_1 = arith.constant 0 : index
    %c0_2 = arith.constant 0 : index
    %c0_3 = arith.constant 0 : index
    %2 = vector.load %arg4[%c0_1, %c0_2, %c0_3] : memref<1x16x24xf32, #tpu.memory_space<vmem>>, vector<1x16x24xf32>
    %3 = vector.shape_cast %2 : vector<1x16x24xf32> to vector<16x24xf32>
    %4 = vector.extract_strided_slice %3 {offsets = [0, 0], sizes = [16, 1], strides = [1, 1]} : vector<16x24xf32> to vector<16x1xf32>
    %5 = vector.extract_strided_slice %1 {offsets = [0, 0], sizes = [1, 128], strides = [1, 1]} : vector<24x128xf32> to vector<1x128xf32>
    %6 = vector.broadcast %4 : vector<16x1xf32> to vector<16x128xf32>
    %7 = vector.broadcast %5 : vector<1x128xf32> to vector<16x128xf32>
    %8 = arith.mulf %6, %7 : vector<16x128xf32>
    %9 = vector.extract_strided_slice %3 {offsets = [0, 1], sizes = [16, 1], strides = [1, 1]} : vector<16x24xf32> to vector<16x1xf32>
    %10 = vector.extract_strided_slice %1 {offsets = [1, 0], sizes = [1, 128], strides = [1, 1]} : vector<24x128xf32> to vector<1x128xf32>
    %11 = vector.broadcast %9 : vector<16x1xf32> to vector<16x128xf32>
    %12 = vector.broadcast %10 : vector<1x128xf32> to vector<16x128xf32>
    %13 = arith.mulf %11, %12 : vector<16x128xf32>
    %14 = vector.extract_strided_slice %3 {offsets = [0, 2], sizes = [16, 1], strides = [1, 1]} : vector<16x24xf32> to vector<16x1xf32>
    %15 = vector.extract_strided_slice %1 {offsets = [2, 0], sizes = [1, 128], strides = [1, 1]} : vector<24x128xf32> to vector<1x128xf32>
    %16 = vector.broadcast %14 : vector<16x1xf32> to vector<16x128xf32>
    %17 = vector.broadcast %15 : vector<1x128xf32> to vector<16x128xf32>
    %18 = arith.mulf %16, %17 : vector<16x128xf32>
    %19 = vector.extract_strided_slice %3 {offsets = [0, 3], sizes = [16, 1], strides = [1, 1]} : vector<16x24xf32> to vector<16x1xf32>
    %20 = vector.extract_strided_slice %1 {offsets = [3, 0], sizes = [1, 128], strides = [1, 1]} : vector<24x128xf32> to vector<1x128xf32>
    %21 = vector.broadcast %19 : vector<16x1xf32> to vector<16x128xf32>
    %22 = vector.broadcast %20 : vector<1x128xf32> to vector<16x128xf32>
    %23 = arith.mulf %21, %22 : vector<16x128xf32>
    %24 = vector.extract_strided_slice %3 {offsets = [0, 4], sizes = [16, 1], strides = [1, 1]} : vector<16x24xf32> to vector<16x1xf32>
    %25 = vector.extract_strided_slice %1 {offsets = [4, 0], sizes = [1, 128], strides = [1, 1]} : vector<24x128xf32> to vector<1x128xf32>
    %26 = vector.broadcast %24 : vector<16x1xf32> to vector<16x128xf32>
    %27 = vector.broadcast %25 : vector<1x128xf32> to vector<16x128xf32>
    %28 = arith.mulf %26, %27 : vector<16x128xf32>
    %29 = arith.addf %8, %28 : vector<16x128xf32>
    %30 = vector.extract_strided_slice %3 {offsets = [0, 5], sizes = [16, 1], strides = [1, 1]} : vector<16x24xf32> to vector<16x1xf32>
    %31 = vector.extract_strided_slice %1 {offsets = [5, 0], sizes = [1, 128], strides = [1, 1]} : vector<24x128xf32> to vector<1x128xf32>
    %32 = vector.broadcast %30 : vector<16x1xf32> to vector<16x128xf32>
    %33 = vector.broadcast %31 : vector<1x128xf32> to vector<16x128xf32>
    %34 = arith.mulf %32, %33 : vector<16x128xf32>
    %35 = arith.addf %13, %34 : vector<16x128xf32>
    %36 = vector.extract_strided_slice %3 {offsets = [0, 6], sizes = [16, 1], strides = [1, 1]} : vector<16x24xf32> to vector<16x1xf32>
    %37 = vector.extract_strided_slice %1 {offsets = [6, 0], sizes = [1, 128], strides = [1, 1]} : vector<24x128xf32> to vector<1x128xf32>
    %38 = vector.broadcast %36 : vector<16x1xf32> to vector<16x128xf32>
    %39 = vector.broadcast %37 : vector<1x128xf32> to vector<16x128xf32>
    %40 = arith.mulf %38, %39 : vector<16x128xf32>
    %41 = arith.addf %18, %40 : vector<16x128xf32>
    %42 = vector.extract_strided_slice %3 {offsets = [0, 7], sizes = [16, 1], strides = [1, 1]} : vector<16x24xf32> to vector<16x1xf32>
    %43 = vector.extract_strided_slice %1 {offsets = [7, 0], sizes = [1, 128], strides = [1, 1]} : vector<24x128xf32> to vector<1x128xf32>
    %44 = vector.broadcast %42 : vector<16x1xf32> to vector<16x128xf32>
    %45 = vector.broadcast %43 : vector<1x128xf32> to vector<16x128xf32>
    %46 = arith.mulf %44, %45 : vector<16x128xf32>
    %47 = arith.addf %23, %46 : vector<16x128xf32>
    %48 = vector.extract_strided_slice %3 {offsets = [0, 8], sizes = [16, 1], strides = [1, 1]} : vector<16x24xf32> to vector<16x1xf32>
    %49 = vector.extract_strided_slice %1 {offsets = [8, 0], sizes = [1, 128], strides = [1, 1]} : vector<24x128xf32> to vector<1x128xf32>
    %50 = vector.broadcast %48 : vector<16x1xf32> to vector<16x128xf32>
    %51 = vector.broadcast %49 : vector<1x128xf32> to vector<16x128xf32>
    %52 = arith.mulf %50, %51 : vector<16x128xf32>
    %53 = arith.addf %29, %52 : vector<16x128xf32>
    %54 = vector.extract_strided_slice %3 {offsets = [0, 9], sizes = [16, 1], strides = [1, 1]} : vector<16x24xf32> to vector<16x1xf32>
    %55 = vector.extract_strided_slice %1 {offsets = [9, 0], sizes = [1, 128], strides = [1, 1]} : vector<24x128xf32> to vector<1x128xf32>
    %56 = vector.broadcast %54 : vector<16x1xf32> to vector<16x128xf32>
    %57 = vector.broadcast %55 : vector<1x128xf32> to vector<16x128xf32>
    %58 = arith.mulf %56, %57 : vector<16x128xf32>
    %59 = arith.addf %35, %58 : vector<16x128xf32>
    %60 = vector.extract_strided_slice %3 {offsets = [0, 10], sizes = [16, 1], strides = [1, 1]} : vector<16x24xf32> to vector<16x1xf32>
    %61 = vector.extract_strided_slice %1 {offsets = [10, 0], sizes = [1, 128], strides = [1, 1]} : vector<24x128xf32> to vector<1x128xf32>
    %62 = vector.broadcast %60 : vector<16x1xf32> to vector<16x128xf32>
    %63 = vector.broadcast %61 : vector<1x128xf32> to vector<16x128xf32>
    %64 = arith.mulf %62, %63 : vector<16x128xf32>
    %65 = arith.addf %41, %64 : vector<16x128xf32>
    %66 = vector.extract_strided_slice %3 {offsets = [0, 11], sizes = [16, 1], strides = [1, 1]} : vector<16x24xf32> to vector<16x1xf32>
    %67 = vector.extract_strided_slice %1 {offsets = [11, 0], sizes = [1, 128], strides = [1, 1]} : vector<24x128xf32> to vector<1x128xf32>
    %68 = vector.broadcast %66 : vector<16x1xf32> to vector<16x128xf32>
    %69 = vector.broadcast %67 : vector<1x128xf32> to vector<16x128xf32>
    %70 = arith.mulf %68, %69 : vector<16x128xf32>
    %71 = arith.addf %47, %70 : vector<16x128xf32>
    %72 = vector.extract_strided_slice %3 {offsets = [0, 12], sizes = [16, 1], strides = [1, 1]} : vector<16x24xf32> to vector<16x1xf32>
    %73 = vector.extract_strided_slice %1 {offsets = [12, 0], sizes = [1, 128], strides = [1, 1]} : vector<24x128xf32> to vector<1x128xf32>
    %74 = vector.broadcast %72 : vector<16x1xf32> to vector<16x128xf32>
    %75 = vector.broadcast %73 : vector<1x128xf32> to vector<16x128xf32>
    %76 = arith.mulf %74, %75 : vector<16x128xf32>
    %77 = arith.addf %53, %76 : vector<16x128xf32>
    %78 = vector.extract_strided_slice %3 {offsets = [0, 13], sizes = [16, 1], strides = [1, 1]} : vector<16x24xf32> to vector<16x1xf32>
    %79 = vector.extract_strided_slice %1 {offsets = [13, 0], sizes = [1, 128], strides = [1, 1]} : vector<24x128xf32> to vector<1x128xf32>
    %80 = vector.broadcast %78 : vector<16x1xf32> to vector<16x128xf32>
    %81 = vector.broadcast %79 : vector<1x128xf32> to vector<16x128xf32>
    %82 = arith.mulf %80, %81 : vector<16x128xf32>
    %83 = arith.addf %59, %82 : vector<16x128xf32>
    %84 = vector.extract_strided_slice %3 {offsets = [0, 14], sizes = [16, 1], strides = [1, 1]} : vector<16x24xf32> to vector<16x1xf32>
    %85 = vector.extract_strided_slice %1 {offsets = [14, 0], sizes = [1, 128], strides = [1, 1]} : vector<24x128xf32> to vector<1x128xf32>
    %86 = vector.broadcast %84 : vector<16x1xf32> to vector<16x128xf32>
    %87 = vector.broadcast %85 : vector<1x128xf32> to vector<16x128xf32>
    %88 = arith.mulf %86, %87 : vector<16x128xf32>
    %89 = arith.addf %65, %88 : vector<16x128xf32>
    %90 = vector.extract_strided_slice %3 {offsets = [0, 15], sizes = [16, 1], strides = [1, 1]} : vector<16x24xf32> to vector<16x1xf32>
    %91 = vector.extract_strided_slice %1 {offsets = [15, 0], sizes = [1, 128], strides = [1, 1]} : vector<24x128xf32> to vector<1x128xf32>
    %92 = vector.broadcast %90 : vector<16x1xf32> to vector<16x128xf32>
    %93 = vector.broadcast %91 : vector<1x128xf32> to vector<16x128xf32>
    %94 = arith.mulf %92, %93 : vector<16x128xf32>
    %95 = arith.addf %71, %94 : vector<16x128xf32>
    %96 = vector.extract_strided_slice %3 {offsets = [0, 16], sizes = [16, 1], strides = [1, 1]} : vector<16x24xf32> to vector<16x1xf32>
    %97 = vector.extract_strided_slice %1 {offsets = [16, 0], sizes = [1, 128], strides = [1, 1]} : vector<24x128xf32> to vector<1x128xf32>
    %98 = vector.broadcast %96 : vector<16x1xf32> to vector<16x128xf32>
    %99 = vector.broadcast %97 : vector<1x128xf32> to vector<16x128xf32>
    %100 = arith.mulf %98, %99 : vector<16x128xf32>
    %101 = arith.addf %77, %100 : vector<16x128xf32>
    %102 = vector.extract_strided_slice %3 {offsets = [0, 17], sizes = [16, 1], strides = [1, 1]} : vector<16x24xf32> to vector<16x1xf32>
    %103 = vector.extract_strided_slice %1 {offsets = [17, 0], sizes = [1, 128], strides = [1, 1]} : vector<24x128xf32> to vector<1x128xf32>
    %104 = vector.broadcast %102 : vector<16x1xf32> to vector<16x128xf32>
    %105 = vector.broadcast %103 : vector<1x128xf32> to vector<16x128xf32>
    %106 = arith.mulf %104, %105 : vector<16x128xf32>
    %107 = arith.addf %83, %106 : vector<16x128xf32>
    %108 = vector.extract_strided_slice %3 {offsets = [0, 18], sizes = [16, 1], strides = [1, 1]} : vector<16x24xf32> to vector<16x1xf32>
    %109 = vector.extract_strided_slice %1 {offsets = [18, 0], sizes = [1, 128], strides = [1, 1]} : vector<24x128xf32> to vector<1x128xf32>
    %110 = vector.broadcast %108 : vector<16x1xf32> to vector<16x128xf32>
    %111 = vector.broadcast %109 : vector<1x128xf32> to vector<16x128xf32>
    %112 = arith.mulf %110, %111 : vector<16x128xf32>
    %113 = arith.addf %89, %112 : vector<16x128xf32>
    %114 = vector.extract_strided_slice %3 {offsets = [0, 19], sizes = [16, 1], strides = [1, 1]} : vector<16x24xf32> to vector<16x1xf32>
    %115 = vector.extract_strided_slice %1 {offsets = [19, 0], sizes = [1, 128], strides = [1, 1]} : vector<24x128xf32> to vector<1x128xf32>
    %116 = vector.broadcast %114 : vector<16x1xf32> to vector<16x128xf32>
    %117 = vector.broadcast %115 : vector<1x128xf32> to vector<16x128xf32>
    %118 = arith.mulf %116, %117 : vector<16x128xf32>
    %119 = arith.addf %95, %118 : vector<16x128xf32>
    %120 = vector.extract_strided_slice %3 {offsets = [0, 20], sizes = [16, 1], strides = [1, 1]} : vector<16x24xf32> to vector<16x1xf32>
    %121 = vector.extract_strided_slice %1 {offsets = [20, 0], sizes = [1, 128], strides = [1, 1]} : vector<24x128xf32> to vector<1x128xf32>
    %122 = vector.broadcast %120 : vector<16x1xf32> to vector<16x128xf32>
    %123 = vector.broadcast %121 : vector<1x128xf32> to vector<16x128xf32>
    %124 = arith.mulf %122, %123 : vector<16x128xf32>
    %125 = arith.addf %101, %124 : vector<16x128xf32>
    %126 = vector.extract_strided_slice %3 {offsets = [0, 21], sizes = [16, 1], strides = [1, 1]} : vector<16x24xf32> to vector<16x1xf32>
    %127 = vector.extract_strided_slice %1 {offsets = [21, 0], sizes = [1, 128], strides = [1, 1]} : vector<24x128xf32> to vector<1x128xf32>
    %128 = vector.broadcast %126 : vector<16x1xf32> to vector<16x128xf32>
    %129 = vector.broadcast %127 : vector<1x128xf32> to vector<16x128xf32>
    %130 = arith.mulf %128, %129 : vector<16x128xf32>
    %131 = arith.addf %107, %130 : vector<16x128xf32>
    %132 = vector.extract_strided_slice %3 {offsets = [0, 22], sizes = [16, 1], strides = [1, 1]} : vector<16x24xf32> to vector<16x1xf32>
    %133 = vector.extract_strided_slice %1 {offsets = [22, 0], sizes = [1, 128], strides = [1, 1]} : vector<24x128xf32> to vector<1x128xf32>
    %134 = vector.broadcast %132 : vector<16x1xf32> to vector<16x128xf32>
    %135 = vector.broadcast %133 : vector<1x128xf32> to vector<16x128xf32>
    %136 = arith.mulf %134, %135 : vector<16x128xf32>
    %137 = arith.addf %113, %136 : vector<16x128xf32>
    %138 = vector.extract_strided_slice %3 {offsets = [0, 23], sizes = [16, 1], strides = [1, 1]} : vector<16x24xf32> to vector<16x1xf32>
    %139 = vector.extract_strided_slice %1 {offsets = [23, 0], sizes = [1, 128], strides = [1, 1]} : vector<24x128xf32> to vector<1x128xf32>
    %140 = vector.broadcast %138 : vector<16x1xf32> to vector<16x128xf32>
    %141 = vector.broadcast %139 : vector<1x128xf32> to vector<16x128xf32>
    %142 = arith.mulf %140, %141 : vector<16x128xf32>
    %143 = arith.addf %119, %142 : vector<16x128xf32>
    %144 = arith.addf %125, %131 : vector<16x128xf32>
    %145 = arith.addf %137, %143 : vector<16x128xf32>
    %146 = arith.addf %144, %145 : vector<16x128xf32>
    %c0_4 = arith.constant 0 : index
    %c0_5 = arith.constant 0 : index
    %147 = vector.load %arg3[%c0_4, %c0_5] : memref<4x128xf32, #tpu.memory_space<vmem>>, vector<4x128xf32>
    %148 = vector.extract_strided_slice %146 {offsets = [0, 0], sizes = [1, 128], strides = [1, 1]} : vector<16x128xf32> to vector<1x128xf32>
    %149 = vector.extract_strided_slice %147 {offsets = [0, 0], sizes = [1, 128], strides = [1, 1]} : vector<4x128xf32> to vector<1x128xf32>
    %150 = arith.mulf %148, %149 : vector<1x128xf32>
    %151 = vector.extract_strided_slice %146 {offsets = [1, 0], sizes = [1, 128], strides = [1, 1]} : vector<16x128xf32> to vector<1x128xf32>
    %152 = vector.extract_strided_slice %147 {offsets = [1, 0], sizes = [1, 128], strides = [1, 1]} : vector<4x128xf32> to vector<1x128xf32>
    %153 = arith.mulf %151, %152 : vector<1x128xf32>
    %154 = arith.addf %150, %153 : vector<1x128xf32>
    %155 = vector.extract_strided_slice %146 {offsets = [2, 0], sizes = [1, 128], strides = [1, 1]} : vector<16x128xf32> to vector<1x128xf32>
    %156 = vector.extract_strided_slice %147 {offsets = [2, 0], sizes = [1, 128], strides = [1, 1]} : vector<4x128xf32> to vector<1x128xf32>
    %157 = arith.mulf %155, %156 : vector<1x128xf32>
    %158 = arith.addf %154, %157 : vector<1x128xf32>
    %159 = vector.extract_strided_slice %146 {offsets = [3, 0], sizes = [1, 128], strides = [1, 1]} : vector<16x128xf32> to vector<1x128xf32>
    %160 = vector.extract_strided_slice %147 {offsets = [3, 0], sizes = [1, 128], strides = [1, 1]} : vector<4x128xf32> to vector<1x128xf32>
    %161 = arith.mulf %159, %160 : vector<1x128xf32>
    %162 = arith.addf %158, %161 : vector<1x128xf32>
    %163 = vector.extract_strided_slice %146 {offsets = [4, 0], sizes = [1, 128], strides = [1, 1]} : vector<16x128xf32> to vector<1x128xf32>
    %164 = vector.extract_strided_slice %147 {offsets = [0, 0], sizes = [1, 128], strides = [1, 1]} : vector<4x128xf32> to vector<1x128xf32>
    %165 = arith.mulf %163, %164 : vector<1x128xf32>
    %166 = vector.extract_strided_slice %146 {offsets = [5, 0], sizes = [1, 128], strides = [1, 1]} : vector<16x128xf32> to vector<1x128xf32>
    %167 = vector.extract_strided_slice %147 {offsets = [1, 0], sizes = [1, 128], strides = [1, 1]} : vector<4x128xf32> to vector<1x128xf32>
    %168 = arith.mulf %166, %167 : vector<1x128xf32>
    %169 = arith.addf %165, %168 : vector<1x128xf32>
    %170 = vector.extract_strided_slice %146 {offsets = [6, 0], sizes = [1, 128], strides = [1, 1]} : vector<16x128xf32> to vector<1x128xf32>
    %171 = vector.extract_strided_slice %147 {offsets = [2, 0], sizes = [1, 128], strides = [1, 1]} : vector<4x128xf32> to vector<1x128xf32>
    %172 = arith.mulf %170, %171 : vector<1x128xf32>
    %173 = arith.addf %169, %172 : vector<1x128xf32>
    %174 = vector.extract_strided_slice %146 {offsets = [7, 0], sizes = [1, 128], strides = [1, 1]} : vector<16x128xf32> to vector<1x128xf32>
    %175 = vector.extract_strided_slice %147 {offsets = [3, 0], sizes = [1, 128], strides = [1, 1]} : vector<4x128xf32> to vector<1x128xf32>
    %176 = arith.mulf %174, %175 : vector<1x128xf32>
    %177 = arith.addf %173, %176 : vector<1x128xf32>
    %178 = vector.extract_strided_slice %146 {offsets = [8, 0], sizes = [1, 128], strides = [1, 1]} : vector<16x128xf32> to vector<1x128xf32>
    %179 = vector.extract_strided_slice %147 {offsets = [0, 0], sizes = [1, 128], strides = [1, 1]} : vector<4x128xf32> to vector<1x128xf32>
    %180 = arith.mulf %178, %179 : vector<1x128xf32>
    %181 = vector.extract_strided_slice %146 {offsets = [9, 0], sizes = [1, 128], strides = [1, 1]} : vector<16x128xf32> to vector<1x128xf32>
    %182 = vector.extract_strided_slice %147 {offsets = [1, 0], sizes = [1, 128], strides = [1, 1]} : vector<4x128xf32> to vector<1x128xf32>
    %183 = arith.mulf %181, %182 : vector<1x128xf32>
    %184 = arith.addf %180, %183 : vector<1x128xf32>
    %185 = vector.extract_strided_slice %146 {offsets = [10, 0], sizes = [1, 128], strides = [1, 1]} : vector<16x128xf32> to vector<1x128xf32>
    %186 = vector.extract_strided_slice %147 {offsets = [2, 0], sizes = [1, 128], strides = [1, 1]} : vector<4x128xf32> to vector<1x128xf32>
    %187 = arith.mulf %185, %186 : vector<1x128xf32>
    %188 = arith.addf %184, %187 : vector<1x128xf32>
    %189 = vector.extract_strided_slice %146 {offsets = [11, 0], sizes = [1, 128], strides = [1, 1]} : vector<16x128xf32> to vector<1x128xf32>
    %190 = vector.extract_strided_slice %147 {offsets = [3, 0], sizes = [1, 128], strides = [1, 1]} : vector<4x128xf32> to vector<1x128xf32>
    %191 = arith.mulf %189, %190 : vector<1x128xf32>
    %192 = arith.addf %188, %191 : vector<1x128xf32>
    %193 = vector.extract_strided_slice %146 {offsets = [12, 0], sizes = [1, 128], strides = [1, 1]} : vector<16x128xf32> to vector<1x128xf32>
    %194 = vector.extract_strided_slice %147 {offsets = [0, 0], sizes = [1, 128], strides = [1, 1]} : vector<4x128xf32> to vector<1x128xf32>
    %195 = arith.mulf %193, %194 : vector<1x128xf32>
    %196 = vector.extract_strided_slice %146 {offsets = [13, 0], sizes = [1, 128], strides = [1, 1]} : vector<16x128xf32> to vector<1x128xf32>
    %197 = vector.extract_strided_slice %147 {offsets = [1, 0], sizes = [1, 128], strides = [1, 1]} : vector<4x128xf32> to vector<1x128xf32>
    %198 = arith.mulf %196, %197 : vector<1x128xf32>
    %199 = arith.addf %195, %198 : vector<1x128xf32>
    %200 = vector.extract_strided_slice %146 {offsets = [14, 0], sizes = [1, 128], strides = [1, 1]} : vector<16x128xf32> to vector<1x128xf32>
    %201 = vector.extract_strided_slice %147 {offsets = [2, 0], sizes = [1, 128], strides = [1, 1]} : vector<4x128xf32> to vector<1x128xf32>
    %202 = arith.mulf %200, %201 : vector<1x128xf32>
    %203 = arith.addf %199, %202 : vector<1x128xf32>
    %204 = vector.extract_strided_slice %146 {offsets = [15, 0], sizes = [1, 128], strides = [1, 1]} : vector<16x128xf32> to vector<1x128xf32>
    %205 = vector.extract_strided_slice %147 {offsets = [3, 0], sizes = [1, 128], strides = [1, 1]} : vector<4x128xf32> to vector<1x128xf32>
    %206 = arith.mulf %204, %205 : vector<1x128xf32>
    %207 = arith.addf %203, %206 : vector<1x128xf32>
    %c0_6 = arith.constant 0 : index
    %c0_7 = arith.constant 0 : index
    %208 = vector.load %arg5[%c0_6, %c0_7] : memref<20x128xf32, #tpu.memory_space<vmem>>, vector<16x128xf32>
    tpu.vector_store %arg5[%c0_6, %c0_7], %146 {strides = array<i32>} : memref<20x128xf32, #tpu.memory_space<vmem>>, vector<16x128xf32>,
    %209 = tpu.concatenate %162, %177, %192, %207 in 0 : vector<1x128xf32>, vector<1x128xf32>, vector<1x128xf32>, vector<1x128xf32> -> vector<4x128xf32>
    %c16 = arith.constant 16 : index
    %c0_8 = arith.constant 0 : index
    %210 = vector.load %arg5[%c16, %c0_8] : memref<20x128xf32, #tpu.memory_space<vmem>>, vector<4x128xf32>
    tpu.vector_store %arg5[%c16, %c0_8], %209 {strides = array<i32>} : memref<20x128xf32, #tpu.memory_space<vmem>>, vector<4x128xf32>,
    return
  }
  func.func @transform_0(%arg0: i32, %arg1: memref<2xi32, #tpu.memory_space<smem>>) -> (i32, i32) {
    %c0_i32 = arith.constant 0 : i32
    %c0_i32_0 = arith.constant 0 : i32
    return %c0_i32, %arg0 : i32, i32
  }
  func.func @transform_1(%arg0: i32, %arg1: memref<2xi32, #tpu.memory_space<smem>>) -> (i32, i32) {
    %c0_i32 = arith.constant 0 : i32
    %c0_i32_0 = arith.constant 0 : i32
    return %c0_i32, %arg0 : i32, i32
  }
  func.func @transform_2(%arg0: i32, %arg1: memref<2xi32, #tpu.memory_space<smem>>) -> (i32, i32, i32) {
    %0 = arith.index_cast %arg0 : i32 to index
    %1 = memref.load %arg1[%0] : memref<2xi32, #tpu.memory_space<smem>>
    %c0_i32 = arith.constant 0 : i32
    %c0_i32_0 = arith.constant 0 : i32
    %c0_i32_1 = arith.constant 0 : i32
    return %1, %c0_i32, %c0_i32_0 : i32, i32, i32
  }
  func.func @transform_3(%arg0: i32, %arg1: memref<2xi32, #tpu.memory_space<smem>>) -> (i32, i32) {
    %c0_i32 = arith.constant 0 : i32
    %c0_i32_0 = arith.constant 0 : i32
    return %c0_i32, %arg0 : i32, i32
  }
}

</mosaic_0001>

<bundles_post_ra>
// kernel: tpu_custom_call.1
= control target key start
LH: loop header
LB: loop body
LE: loop exit
PB: predicated region body
PF: predicated region fallthrough
CT: control target
= control target key end

     0   :  { %s1232_s15 = smov [#allocation3]   ;;  %s1802_s0 = inlined_call_operand.hbm [shape: s32[2], index: 0, kind: input, shape index: {}]   ;;  %s1803_s1 = inlined_call_operand.hbm [shape: bf16[24,256], index: 1, kind: input, shape index: {}]   ;;  %s1804_s2 = inlined_call_operand.hbm [shape: f32[4,256], index: 2, kind: input, shape index: {}]   ;;  %s1805_s3 = inlined_call_operand.hbm [shape: f32[2,16,24], index: 3, kind: input, shape index: {}]   ;;  %s1806_s4 = inlined_call_operand.hbm [shape: f32[20,256], index: 4, kind: output, shape index: {}]  }
   0x1   :  { %1818 = sst [smem:[#allocation24_spill]] %s1803_s1 }
   0x2   :  { %1819 = sst [smem:[#allocation25_spill]] %s1804_s2 }
   0x3   :  { %10 = dma.hbm_to_smem %s1802_s0, 16, %s1232_s15, [#allocation2] }
   0x4   :  { %1186 = dma.done.wait [#allocation2], 16 }
   0x5   :  { %1187 = vsyncadd [#allocation2], 4294967280 }
   0x6   :  { %12 = sfence }
   0x7   :  { %13 = vsyncpa [#allocation5], 0 }
   0x8   :  { %15 = vsyncpa [#allocation5 + $0x1], 0 }
   0x9   :  { %16 = vsyncpa [#allocation8], 0 }
   0xa   :  { %18 = vsyncpa [#allocation8 + $0x1], 0 }
   0xb   :  { %19 = vsyncpa [#allocation6], 0 }
   0xc   :  { %21 = vsyncpa [#allocation6 + $0x1], 0  ;;  %s1296_s18 = smov 0   ;;  %s1298_s19 = smov 0  }
   0xd   :  { %s1300_s20 = smov 0   ;;  %s1302_s21 = smov 0  }
   0xe   :  { %s1304_s22 = smov 0   ;;  %s1306_s0 = smov 0  }
   0xf   :  { %s1308_s23 = smov 0  }
  0x10 LB: > { %1820 = sst [smem:[#allocation18_spill]] %s1226_s0  ;;  %s1330_s24 = sadd.s32 4294967295, %s1230_s23   ;;  %s1230_s23 = sphi %s1308_s23, %s1850_s23   ;;  %s1226_s0 = sphi %s1306_s0, %s1853_s0   ;;  %s1222_s22 = sphi %s1304_s22, %s1858_s22   ;;  %s1218_s21 = sphi %s1302_s21, %s1857_s21   ;;  %s1214_s20 = sphi %s1300_s20, %s1856_s20   ;;  %s1210_s19 = sphi %s1298_s19, %s1855_s19   ;;  %s1206_s18 = sphi %s1296_s18, %s1854_s18  }
  0x11   : > { %s858_s25 = sadd.s32 4294967294, %s1230_s23   ;;  %s1334_s26 = sadd.s32 1, %s1230_s23  }
  0x12   : > { %1821 = sst [smem:[#allocation19_spill]] %s1334_s26  ;;  %s34_s27 = sadd.s32 1, %s1226_s0 }
  0x13   : > { %s31_s28 = ssub.s32 %s1230_s23, %s1334_s26  ;;  %p41_p0 = scmp.ne.s32.totalorder %s1226_s0, %s1222_s22 }
  0x14   : > { %p32_p1 = scmp.eq.s32.totalorder %s31_s28, 0  ;;  %p42_p2 = scmp.eq.s32.totalorder %s1230_s23, 0 }
  0x15   : > { %p47_p3 = scmp.ne.s32.totalorder %s1222_s22, %s1218_s21  ;;  %p48_p4 = scmp.eq.s32.totalorder %s1330_s24, 0 }
  0x16   : > { %s1346_s29 = scalar_select %p32_p1, %s1226_s0, %s34_s27  }
  0x17   : > { %p1351_p5 = por %p42_p2, %p41_p0  ;;  %p1358_p6 = por %p48_p4, %p47_p3 }
  0x18   : > { %1822 = sst [smem:[#allocation20_spill]] %s1346_s29  ;;  %s88_s7 = sadd.s32 1, %s1214_s20 }
  0x19   : > { %s1824_s5 = scalar_select %p1358_p6, 1, 0 }
  0x1a   : > { %s83_s6 = sld [smem:[#allocation3 + %s1230_s23]]  ;;  %p95_p7 = scmp.ne.s32.totalorder %s1214_s20, %s1210_s19 }
  0x1b   : > { %s84_s8 = sld [smem:[#allocation3 + %s1334_s26]]  ;;  %p101_p8 = scmp.ne.s32.totalorder %s1210_s19, %s1206_s18 }
  0x1c   : > { %p125_p9 = scmp.eq.s32.totalorder %s1330_s24, 1  ;;  %p1369_p10 = por %p95_p7, %p42_p2 }
  0x1d   : > { %p131_p11 = scmp.eq.s32.totalorder %s858_s25, 1  ;;  %p1373_p12 = por %p101_p8, %p48_p4 }
  0x1e   : > { %s1825_s9 = scalar_select %p1369_p10, 1, 0 }
  0x1f   : > { %s1826_s10 = scalar_select %p1373_p12, 1, 0 }
  0x20   : > { %p1380_p13 = por %p125_p9, %p41_p0  ;;  %p1387_p1 = por %p131_p11, %p47_p3 }
  0x21   : > { %p1810_p7 = scmp.lt.s32.totalorder %s1230_s23, 2  ;;  %s1394_s13 = sand.u32 1, %s1226_s0  }
  0x22   : > { %s1827_s11 = scalar_select %p1380_p13, 1, 0 }
  0x23   : > { %s1828_s12 = scalar_select %p1387_p1, 1, 0 }
  0x24   : > { %s85_s14 = ssub.s32 %s83_s6, %s84_s8  ;;  %s878_s15 = smul.u32 12, %s1394_s13 }
  0x25   : > { %1829 = sst [smem:[#allocation21_spill]] %s1828_s12  ;;  %p86_p4 = scmp.eq.s32.totalorder %s85_s14, 0 }
  0x26   : > { %s861_s16 = sshll.u32 %s1230_s23, 6  ;;  %p1402_p0 = pnand %p1810_p7, %p1351_p5 }
  0x27   : > { %s1407_s18 = scalar_select %p86_p4, %s1214_s20, %s88_s7  }
  0x28   : > { %s1832_s1 = sld [smem:[#allocation24_spill]]  ;;  %s155_s6 = scalar_lea.vmem [#allocation4], %s878_s15 }
  0x29   : > { %1831 = sst [smem:[#allocation22_spill]] %s1407_s18  ;;  %s161_s8 = sshll.u32 %s155_s6, 4  ;;  %s1414_s8 = int_to_ptr.vmem [resolvable:$true] %s161_s8 }
  0x2a   : > { %s171_s14 = sand.u32 1, %s1230_s23   ;;  %s862_s30 = sshll.u32 %s1394_s13, 2 }
  0x2b   : > { %s1833_s2 = sld [smem:[#allocation25_spill]]  ;;  %s175_s7 = scalar_lea.vmem [#allocation7], %s862_s30 }
  0x2c   : > { %s182_s25 = sshll.u32 %s175_s7, 4  ;;  %p1427_p3 = pnand %p1810_p7, %p1369_p10  ;;  %s183_s25 = int_to_ptr.vmem [resolvable:$true] %s182_s25 }
  0x2d   : > { %s1432_s15 = scalar_lea.sflag [#allocation8], %s171_s14  ;;  %p1050_p9 = pneg %p1402_p0 }
  0x2e   : > { %s1412_s28 = scalar_lea.hbm %s1832_s1, %s861_s16 }
  0x2f   : > { %s1834_s27 = scalar_select %p1427_p3, 1, 0 }
  0x31   : > { %s1421_s26 = scalar_lea.hbm %s1833_s2, %s861_s16  ;;  %s1053_s16 = scalar_lea.hbm %s1833_s2, 128 }
  0x32   : > { %s1048_s6 = scalar_lea.hbm %s1421_s26, 64  ;;  %p1054_p2 = scmp.lt.s32.totalorder %s1421_s26, %s1833_s2 }
  0x33   : > { %p1049_p8 = scmp.ne.s32.totalorder %s1421_s26, %s1048_s6  ;;  %p1055_p7 = scmp.lt.s32.totalorder %s1053_s16, %s1048_s6 }
  0x35   : > { %p1051_p11 = pnand %p1050_p9, %p1049_p8  ;;  %p1056_p5 = por %p1055_p7, %p1054_p2 }
  0x37   : > { %p1052_p4 = pneg %p1051_p11 }
  0x39   : > { %p1057_p1 = pnand %p1056_p5, %p1052_p4 }
  0x3b   : > { %1060 = shalt.err (!%p1057_p1)
}
  0x3c   : > { %s1061_s14 = scalar_lea.vmem %s183_s25, 64  ;;  %s1233_s18 = smov [#allocation7]  }
  0x3d   : > { %p1062_p13 = scmp.ne.s32.totalorder %s183_s25, %s1061_s14  ;;  %s1066_s12 = sshll.u32 %s1233_s18, 4  ;;  %s1067_s12 = int_to_ptr.vmem [resolvable:$false] %s1066_s12 }
  0x3e   : > { %s1068_s0 = scalar_lea.vmem %s1067_s12, 128  ;;  %p1069_p11 = scmp.lt.s32.totalorder %s183_s25, %s1067_s12 }
  0x3f   : > { %p1064_p12 = pnand %p1062_p13, %p1050_p9  ;;  %p1070_p6 = scmp.lt.s32.totalorder %s1068_s0, %s1061_s14 }
  0x41   : > { %p1065_p8 = pneg %p1064_p12  ;;  %p1071_p3 = por %p1070_p6, %p1069_p11 }
  0x43   : > { %p1072_p10 = pnand %p1071_p3, %p1065_p8 }
  0x45   : > { %1075 = shalt.err (!%p1072_p10)
}
  0x46   : > { %897 = dma.hbm_to_vmem [thread:$0]  (!%p1402_p0), %s1421_s26, 64, %s183_s25, %s1432_s15  }
  0x47   : > { %p209_p12 = scmp.lt.s32.totalorder %s1230_s23, 3  ;;  %p1835_p13 = scmp.ge.s32.totalorder %s1230_s23, 1 }
  0x48   : > { %s152_s18 = scalar_lea.sflag [#allocation5], %s1394_s13  ;;  %s1076_s6 = scalar_lea.hbm %s1412_s28, 192 }
  0x49   : > { %p1458_p1 = pnand %p1835_p13, %p209_p12  ;;  %p1077_p6 = scmp.ne.s32.totalorder %s1412_s28, %s1076_s6 }
  0x4a   : > { %s1081_s30 = scalar_lea.hbm %s1832_s1, 384  ;;  %p1082_p7 = scmp.lt.s32.totalorder %s1412_s28, %s1832_s1 }
  0x4b   : > { %s1836_s12 = scalar_select %p1458_p1, 1, 0 }
  0x4c   : > { %p1079_p10 = pnand %p1077_p6, %p1050_p9  ;;  %p1083_p3 = scmp.lt.s32.totalorder %s1081_s30, %s1076_s6 }
  0x4e   : > { %p1080_p2 = pneg %p1079_p10  ;;  %p1084_p5 = por %p1083_p3, %p1082_p7 }
  0x50   : > { %p1085_p4 = pnand %p1084_p5, %p1080_p2 }
  0x52   : > { %1088 = shalt.err (!%p1085_p4)
}
  0x53   : > { %s1089_s26 = scalar_lea.vmem %s1414_s8, 192  ;;  %s1234_s25 = smov [#allocation4]  }
  0x54   : > { %p1090_p8 = scmp.ne.s32.totalorder %s1414_s8, %s1089_s26  ;;  %s1094_s0 = sshll.u32 %s1234_s25, 4  ;;  %s1095_s0 = int_to_ptr.vmem [resolvable:$false] %s1094_s0 }
  0x55   : > { %s1096_s29 = scalar_lea.vmem %s1095_s0, 384  ;;  %p1097_p13 = scmp.lt.s32.totalorder %s1414_s8, %s1095_s0 }
  0x56   : > { %p1092_p11 = pnand %p1090_p8, %p1050_p9  ;;  %p1098_p6 = scmp.lt.s32.totalorder %s1096_s29, %s1089_s26 }
  0x58   : > { %p1093_p12 = pneg %p1092_p11  ;;  %p1099_p10 = por %p1098_p6, %p1097_p13 }
  0x5a   : > { %p1100_p7 = pnand %p1099_p10, %p1093_p12 }
  0x5c   : > { %1103 = shalt.err (!%p1100_p7)
}
  0x5d   : > { %s1235_s6 = smov 128   ;;  %s1236_s16 = smov 64  }
  0x5e   : > { %s1237_s30 = smov 4   ;;  %s191_s7 = sand.u32 1, %s1214_s20  }
  0x5f   : > { %894 = dma.hbm_to_vmem [thread:$0]  (!%p1402_p0), %s1412_s28, 192, %s1414_s8, %s152_s18, %s1235_s6, %s1236_s16, %s1237_s30  }
  0x60   : > { %s864_s14 = sshll.u32 %s191_s7, 4  ;;  %p1837_p9 = scmp.ne.s32.totalorder %s1825_s9, 0 }
  0x61   : > { %p1838_p2 = scmp.lt.s32.totalorder %s1230_s23, 2  ;;  %s193_s29 = scalar_lea.vmem [#allocation9], %s864_s14 }
  0x62   : > { %s883_s26 = scalar_select %p1837_p9, [#allocation3], [#allocation11] }
  0x63   : > { %s884_s25 = scalar_select %p1837_p9, %s1230_s23, 0 }
  0x64   : > { %s1860_s26 = smov (!%p1838_p2, %s883_s26), [#allocation12]  ;;  %p1839_p3 = pmov %p1838_p2 }
  0x65   : > { %s201_s1 = sshll.u32 %s193_s29, 4  ;;  %p1840_p5 = scmp.ne.s32.totalorder %s1834_s27, 0  ;;  %s1498_s1 = int_to_ptr.vmem [resolvable:$true] %s201_s1 }
  0x66   : > { %s1862_s25 = smov (!%p1839_p3, %s884_s25), 0  ;;  %s1109_s16 = scalar_lea.hbm %s1805_s3, 512 }
  0x67   : > { %s194_s0 = sld [smem:[%s1860_s26 + %s1862_s25]]  ;;  %p1106_p4 = pneg %p1840_p5 }
  0x6d   : > { %s873_s17 = sshll.u32 %s194_s0, 8 }
  0x6e   : > { %s1503_s28 = scalar_lea.hbm %s1805_s3, %s873_s17 }
  0x6f   : > { %s1104_s9 = scalar_lea.hbm %s1503_s28, 256  ;;  %p1110_p12 = scmp.lt.s32.totalorder %s1503_s28, %s1805_s3 }
  0x70   : > { %p1105_p0 = scmp.ne.s32.totalorder %s1503_s28, %s1104_s9  ;;  %p1111_p13 = scmp.lt.s32.totalorder %s1109_s16, %s1104_s9 }
  0x72   : > { %p1107_p8 = pnand %p1106_p4, %p1105_p0  ;;  %p1112_p6 = por %p1111_p13, %p1110_p12 }
  0x74   : > { %p1108_p11 = pneg %p1107_p8 }
  0x76   : > { %p1113_p10 = pnand %p1112_p6, %p1108_p11 }
  0x78   : > { %1116 = shalt.err (!%p1113_p10)
}
  0x79   : > { %s1117_s2 = scalar_lea.vmem %s1498_s1, 256  ;;  %s1238_s14 = smov [#allocation9]  }
  0x7a   : > { %p1118_p7 = scmp.ne.s32.totalorder %s1498_s1, %s1117_s2  ;;  %s1122_s26 = sshll.u32 %s1238_s14, 4  ;;  %s1123_s26 = int_to_ptr.vmem [resolvable:$false] %s1122_s26 }
  0x7b   : > { %s1124_s25 = scalar_lea.vmem %s1123_s26, 512  ;;  %p1125_p3 = scmp.lt.s32.totalorder %s1498_s1, %s1123_s26 }
  0x7c   : > { %p1120_p9 = pnand %p1118_p7, %p1106_p4  ;;  %p1126_p0 = scmp.lt.s32.totalorder %s1124_s25, %s1117_s2 }
  0x7e   : > { %p1121_p2 = pneg %p1120_p9  ;;  %p1127_p8 = por %p1126_p0, %p1125_p3 }
  0x80   : > { %p1128_p1 = pnand %p1127_p8, %p1121_p2 }
  0x82   : > { %1131 = shalt.err (!%p1128_p1)
}
  0x83   : > { %s1239_s0 = smov 8   ;;  %p1841_p4 = scmp.ne.s32.totalorder %s1836_s12, 0 }
  0x84   : > { %902 = dma.hbm_to_vmem [thread:$0]  (!%p1840_p5), %s1503_s28, 256, %s1498_s1, %s1432_s15, %s1235_s6, %s1235_s6, %s1239_s0  }
  0x85   : > { %213 = sbr.rel (%p1841_p4) target bundleno = 459 (0x1cb), region = 32 }
  0x8a   : > { %s1529_s29 = sand.u32 1, %s1222_s22   ;;  %p1842_p1 = scmp.ne.s32.totalorder %s1824_s5, 0 }
  0x8b   : > { %s879_s17 = smul.u32 12, %s1529_s29  ;;  %s216_s13 = scalar_lea.sflag [#allocation5], %s1529_s29 }
  0x8d   : > { %s1533_s9 = scalar_lea.vmem [#allocation4], %s879_s17 }
  0x8e   : > { %1189 = dma.done.wait (%p1842_p1), %s216_s13, 192  }
  0x8f   : > { %1191 = vsyncadd (%p1842_p1), %s216_s13, 4294967104  ;;  %s224_s1 = sand.u32 1, %s1330_s24   ;;  %s868_s27 = sshll.u32 %s1529_s29, 2 }
  0x90   : > { %s225_s15 = scalar_lea.sflag [#allocation8], %s224_s1  ;;  %s1541_s12 = scalar_lea.vmem [#allocation7], %s868_s27 }
  0x91   : > { %1193 = dma.done.wait (%p1842_p1), %s225_s15, 64  }
  0x92   : > { %1195 = vsyncadd (%p1842_p1), %s225_s15, 4294967232  ;;  %s235_s6 = sand.u32 1, %s1210_s19   ;;  %p1843_p5 = scmp.ne.s32.totalorder %s1826_s10, 0 }
  0x93   : > { %s869_s28 = sshll.u32 %s235_s6, 4 }
  0x94   : > { %s237_s8 = scalar_lea.vmem [#allocation9], %s869_s28 }
  0x95   : > { %1197 = dma.done.wait (%p1843_p5), %s225_s15, 256  }
  0x96   : > { %1199 = vsyncadd (%p1843_p5), %s225_s15, 4294967040  ;;  %v1240_v0 = vmov 1   ;;  %v1241_v1 = vmov 0   ;;  %v1552_v2 = vld [vmem:[%s237_s8] sm:$0xff]  ;;  %v1556_v3 = vld [vmem:[%s237_s8 + $0x8] sm:$0xff]  ;;  %v1242_v4 = vmov 2   ;;  %v289_v30 = vlaneseq }
  0x97   : > { %998 = vset.pattern.permute.xlu1 %v1240_v0  ;;  %997 = vset.pattern.permute.xlu0 %v1241_v1  ;;  %v1243_v5 = vmov 3   ;;  %v1244_v6 = vmov 4   ;;  %v1245_v7 = vmov 5   ;;  %v1246_v8 = vmov 6   ;;  %v875_v33 = vld [vmem:[%s1533_s9] sm:$0xff]   ;;  %s880_s5 = smul.u32 24, %s1529_s29 }
  0x98   : > { %296 = vperm.xlu1 %998, %v1552_v2   ;;  %281 = vperm.xlu0 %997, %v1552_v2   ;;  %v1247_v9 = vmov 8   ;;  %v1248_v10 = vmov 9   ;;  %v1249_v11 = vmov 7   ;;  %v1250_v12 = vmov 11   ;;  %s870_s16 = sshll.u32 %s1330_s24, 7  ;;  %s730_s24 = scalar_lea.sflag [#allocation6], %s1529_s29 }
  0x99   : > { %v1251_v13 = vmov 12   ;;  %v1252_v14 = vmov 15   ;;  %v1253_v15 = vmov 10   ;;  %v1254_v16 = vmov 17   ;;  %s1732_s10 = scalar_lea.vmem [#allocation10], %s880_s5  ;;  %s1749_s2 = scalar_lea.hbm %s1806_s4, %s870_s16 }
  0x9a   : > { %v1255_v17 = vmov 16   ;;  %v1256_v18 = vmov 19   ;;  %v1257_v19 = vmov 22   ;;  %v1258_v20 = vmov 13   ;;  %s742_s18 = sshll.u32 %s1732_s10, 4  ;;  %p1846_p12 = scmp.ne.s32.totalorder %s1827_s11, 0  ;;  %s1744_s18 = int_to_ptr.vmem [resolvable:$true] %s742_s18 }
  0x9b   : > { %v1259_v21 = vmov 21   ;;  %v1260_v22 = vmov 14   ;;  %v1261_v23 = vmov 23   ;;  %v1262_v24 = vmov 18   ;;  %s1132_s14 = scalar_lea.vmem %s1744_s18, 384  ;;  %s1264_s26 = smov [#allocation10]  }
  0x9c   : > { %300 = vperm.xlu1 %998, %v1556_v3   ;;  %286 = vperm.xlu0 %997, %v1556_v3   ;;  %v1263_v25 = vmov 20   ;;  %v290_v31 = vshrl.u32 %v289_v30, 7  ;;  %v876_v35 = vunpack.c.l.bf16 %v875_v33  ;;  %v1649_v60 = vunpack.c.h.bf16 %v875_v33  ;;  %p1133_p11 = scmp.ne.s32.totalorder %s1744_s18, %s1132_s14  ;;  %s1136_s25 = sshll.u32 %s1264_s26, 4  ;;  %s1137_s25 = int_to_ptr.vmem [resolvable:$false] %s1136_s25 }
  0x9d   : > { %vm722_vm0 = vcmask 1040384   ;;  %vm724_vm1 = vcmask 1041408   ;;  %vm726_vm2 = vcmask 1042432   ;;  %s1138_s0 = scalar_lea.vmem %s1137_s25, 768  ;;  %p1139_p10 = scmp.lt.s32.totalorder %s1744_s18, %s1137_s25 }
  0x9e   : > { %v1608_v34 = vsub.s32 1, %v290_v31  ;;  %v1610_v36 = vsub.s32 5, %v290_v31  ;;  %v1623_v45 = vsub.s32 3, %v290_v31  ;;  %v1627_v47 = vsub.s32 7, %v290_v31  ;;  %p1134_p13 = pnand %p1133_p11, %p1846_p12  ;;  %p1140_p7 = scmp.lt.s32.totalorder %s1138_s0, %s1132_s14 }
  0x9f   : > { %v1639_v52 = vsub.s32 0, %v290_v31  ;;  %v1641_v53 = vsub.s32 4, %v290_v31 }
  0xa0   : > { %1000 = vset.pattern.permute.xlu1 %v1242_v4  ;;  %999 = vset.pattern.permute.xlu0 %v1242_v4  ;;  %v1616_v39 = vrot.slane %v876_v35, %v1608_v34  ;;  %v1619_v40 = vrot.slane %v876_v35, %v1610_v36  ;;  %v1632_v49 = vrot.slane %v876_v35, %v1623_v45  ;;  %p1135_p6 = pneg %p1134_p13  ;;  %p1141_p9 = por %p1140_p7, %p1139_p10 }
  0xa1   : > { %314 = vperm.xlu1 %1000, %v1556_v3   ;;  %310 = vperm.xlu0 %999, %v1552_v2   ;;  %v1635_v50 = vrot.slane %v876_v35, %v1627_v47  ;;  %v292_v58 = vrot.slane %v876_v35, %v1639_v52  ;;  %v348_v59 = vrot.slane %v876_v35, %v1641_v53 }
  0xa2   : > { %v412_v1 = vrot.slane %v1649_v60, %v1639_v52  ;;  %p1142_p2 = pnand %p1141_p9, %p1135_p6 }
  0xa5   : > { %1001 = vset.pattern.permute.xlu1 %v1243_v5  ;;  %1002 = vset.pattern.permute.xlu0 %v1243_v5 }
  0xa6   : > { %324 = vperm.xlu1 %1001, %v1552_v2   ;;  %328 = vperm.xlu0 %1002, %v1556_v3  }
  0xaa   : > { %1003 = vset.pattern.permute.xlu1 %v1244_v6  ;;  %1004 = vset.pattern.permute.xlu0 %v1245_v7  ;;  %v1657_v6 = vsub.s32 6, %v290_v31 }
  0xab   : > { %338 = vperm.xlu1 %1003, %v1552_v2   ;;  %354 = vperm.xlu0 %1004, %v1552_v2  }
  0xaf   : > { %342 = vperm.xlu1 %1003, %v1556_v3   ;;  %1007 = vset.pattern.permute.xlu0 %v1246_v8 }
  0xb0   : > { %374 = vperm.xlu0 %1007, %v1556_v3  }
  0xb3   : > { %1005 = vset.pattern.permute.xlu1 %v1245_v7 }
  0xb4   : > { %358 = vperm.xlu1 %1005, %v1556_v3   ;;  %1009 = vset.pattern.permute.xlu0 %v1247_v9 }
  0xb5   : > { %402 = vperm.xlu0 %1009, %v1552_v2  }
  0xb8   : > { %1006 = vset.pattern.permute.xlu1 %v1246_v8  ;;  %v319_v8 = vsub.s32 2, %v290_v31 }
  0xb9   : > { %370 = vperm.xlu1 %1006, %v1552_v2   ;;  %1012 = vset.pattern.permute.xlu0 %v1248_v10 }
  0xba   : > { %422 = vperm.xlu0 %1012, %v1556_v3  }
  0xbd   : > { %1008 = vset.pattern.permute.xlu1 %v1249_v11 }
  0xbe   : > { %386 = vperm.xlu1 %1008, %v1552_v2   ;;  %1014 = vset.pattern.permute.xlu0 %v1250_v12 }
  0xbf   : > { %450 = vperm.xlu0 %1014, %v1552_v2  }
  0xc2   : > { %390 = vperm.xlu1 %1008, %v1556_v3  }
  0xc3   : > { %1017 = vset.pattern.permute.xlu0 %v1251_v13 }
  0xc4   : > { %470 = vperm.xlu0 %1017, %v1556_v3  }
  0xc6   : > { %1010 = vset.pattern.permute.xlu1 %v1247_v9 }
  0xc7   : > { %406 = vperm.xlu1 %1010, %v1556_v3  }
  0xc8   : > { %1020 = vset.pattern.permute.xlu0 %v1252_v14 }
  0xc9   : > { %514 = vperm.xlu0 %1020, %v1552_v2  }
  0xcb   : > { %1011 = vset.pattern.permute.xlu1 %v1248_v10  ;;  %v380_v10 = vrot.slane %v876_v35, %v1657_v6 }
  0xcc   : > { %418 = vperm.xlu1 %1011, %v1552_v2  }
  0xcd   : > { %518 = vperm.xlu0 %1020, %v1556_v3  }
  0xd0   : > { %1013 = vset.pattern.permute.xlu1 %v1253_v15 }
  0xd1   : > { %434 = vperm.xlu1 %1013, %v1552_v2   ;;  %1024 = vset.pattern.permute.xlu0 %v1254_v16 }
  0xd2   : > { %546 = vperm.xlu0 %1024, %v1552_v2  }
  0xd5   : > { %438 = vperm.xlu1 %1013, %v1556_v3  }
  0xd6   : > { %1027 = vset.pattern.permute.xlu0 %v1255_v17 }
  0xd7   : > { %534 = vperm.xlu0 %1027, %v1556_v3  }
  0xd9   : > { %1015 = vset.pattern.permute.xlu1 %v1250_v12  ;;  %v320_v12 = vrot.slane %v876_v35, %v319_v8 }
  0xda   : > { %454 = vperm.xlu1 %1015, %v1556_v3  }
  0xdb   : > { %1030 = vset.pattern.permute.xlu0 %v1256_v18 }
  0xdc   : > { %582 = vperm.xlu0 %1030, %v1556_v3  }
  0xde   : > { %1016 = vset.pattern.permute.xlu1 %v1251_v13 }
  0xdf   : > { %466 = vperm.xlu1 %1016, %v1552_v2  }
  0xe0   : > { %1033 = vset.pattern.permute.xlu0 %v1257_v19 }
  0xe1   : > { %626 = vperm.xlu0 %1033, %v1552_v2  }
  0xe3   : > { %1018 = vset.pattern.permute.xlu1 %v1258_v20 }
  0xe4   : > { %482 = vperm.xlu1 %1018, %v1552_v2  }
  0xe5   : > { %1036 = vset.pattern.permute.xlu0 %v1259_v21 }
  0xe6   : > { %614 = vperm.xlu0 %1036, %v1556_v3  }
  0xe8   : > { %1019 = vset.pattern.permute.xlu1 %v1260_v22 }
  0xe9   : > { %498 = vperm.xlu1 %1019, %v1552_v2  }
  0xea   : > { %1039 = vset.pattern.permute.xlu0 %v1261_v23 }
  0xed   : > { %1021 = vset.pattern.permute.xlu1 %v1258_v20 }
  0xee   : > { %486 = vperm.xlu1 %1021, %v1556_v3  }
  0xf2   : > { %1022 = vset.pattern.permute.xlu1 %v1260_v22 }
  0xf3   : > { %502 = vperm.xlu1 %1022, %v1556_v3  }
  0xf7   : > { %1023 = vset.pattern.permute.xlu1 %v1255_v17 }
  0xf8   : > { %530 = vperm.xlu1 %1023, %v1552_v2  }
  0xfc   : > { %1025 = vset.pattern.permute.xlu1 %v1262_v24 }
  0xfd   : > { %562 = vperm.xlu1 %1025, %v1552_v2  }
 0x101   : > { %1026 = vset.pattern.permute.xlu1 %v1256_v18 }
 0x102   : > { %578 = vperm.xlu1 %1026, %v1552_v2  }
 0x106   : > { %1028 = vset.pattern.permute.xlu1 %v1254_v16  ;;  %v444_v16 = vrot.slane %v1649_v60, %v319_v8 }
 0x107   : > { %550 = vperm.xlu1 %1028, %v1556_v3  }
 0x10b   : > { %1029 = vset.pattern.permute.xlu1 %v1262_v24 }
 0x10c   : > { %566 = vperm.xlu1 %1029, %v1556_v3  }
 0x110   : > { %1031 = vset.pattern.permute.xlu1 %v1263_v25 }
 0x111   : > { %594 = vperm.xlu1 %1031, %v1552_v2  }
 0x113   : > { %v1599_v26 = vpop.permute.xlu1 %296  ;;  %v1613_v38 = vpop.permute.xlu0 %281 }
 0x115   : > { %1032 = vset.pattern.permute.xlu1 %v1259_v21 }
 0x116   : > { %610 = vperm.xlu1 %1032, %v1552_v2  }
 0x117   : > { %v301_v27 = vpop.permute.xlu1 %300  ;;  %v287_v44 = vpop.permute.xlu0 %286 }
 0x118   : > { %v308_v42 = vmul.f32 %v1616_v39, %v301_v27  ;;  %v294_v63 = vmul.f32 %v292_v58, %v287_v44 }
 0x11a   : > { %1034 = vset.pattern.permute.xlu1 %v1261_v23 }
 0x11b   : > { %642 = vperm.xlu1 %1034, %v1552_v2  }
 0x11c   : > { %v315_v28 = vpop.permute.xlu1 %314  ;;  %v1637_v51 = vpop.permute.xlu0 %310 }
 0x11d   : > { %v322_v15 = vmul.f32 %v320_v12, %v315_v28 }
 0x11f   : > { %1035 = vset.pattern.permute.xlu1 %v1263_v25 }
 0x120   : > { %598 = vperm.xlu1 %1035, %v1556_v3  }
 0x121   : > { %v325_v29 = vpop.permute.xlu1 %324  ;;  %v1653_v62 = vpop.permute.xlu0 %328 }
 0x122   : > { %v335_v55 = vmul.f32 %v1632_v49, %v325_v29 }
 0x124   : > { %1037 = vset.pattern.permute.xlu1 %v1257_v19 }
 0x125   : > { %630 = vperm.xlu1 %1037, %v1556_v3  }
 0x126   : > { %v1605_v32 = vpop.permute.xlu1 %338  ;;  %v355_v5 = vpop.permute.xlu0 %354 }
 0x129   : > { %1038 = vset.pattern.permute.xlu1 %v1261_v23 }
 0x12a   : > { %646 = vperm.xlu1 %1038, %v1556_v3   ;;  %v343_v37 = vpop.permute.xlu1 %342 }
 0x12b   : > { %v350_v0 = vmul.f32 %v348_v59, %v343_v37  ;;  %v375_v11 = vpop.permute.xlu0 %374 }
 0x12c   : > { %v382_v14 = vmul.f32 %v380_v10, %v375_v11  ;;  %v349_v11 = vmul.f32 %v348_v59, %v1605_v32 }
 0x12d   : > { %v352_v3 = vadd.f32 %v350_v0, %v294_v63  ;;  %v492_v63 = vrot.slane %v1649_v60, %v1610_v36 }
 0x12e   : > { %v384_v18 = vadd.f32 %v382_v14, %v322_v15 }
 0x12f   : > { %v359_v41 = vpop.permute.xlu1 %358 }
 0x130   : > { %v366_v43 = vmul.f32 %v1619_v40, %v359_v41  ;;  %v403_v24 = vpop.permute.xlu0 %402 }
 0x132   : > { %v1625_v46 = vadd.f32 %v366_v43, %v308_v42 }
 0x134   : > { %v1629_v48 = vpop.permute.xlu1 %370 }
 0x135   : > { %v423_v29 = vpop.permute.xlu0 %422 }
 0x139   : > { %v387_v54 = vpop.permute.xlu1 %386 }
 0x13a   : > { %v397_v56 = vmul.f32 %v1635_v50, %v387_v54  ;;  %v451_v30 = vpop.permute.xlu0 %450  ;;  %v273_v54 = vld [vmem:[%s1533_s9 + $0x8] sm:$0xf] }
 0x13b   : > { %v276_v0 = vunpack.c.l.bf16 %v273_v54 }
 0x13c   : > { %v1645_v57 = vadd.f32 %v397_v56, %v335_v55  ;;  %v365_v55 = vmul.f32 %v1619_v40, %v355_v5  ;;  %v428_v56 = vrot.slane %v1649_v60, %v1608_v34  ;;  %v1691_v40 = vrot.slane %v1649_v60, %v1623_v45 }
 0x13d   : > { %v1651_v61 = vpop.permute.xlu1 %390  ;;  %v476_v5 = vrot.slane %v1649_v60, %v1641_v53  ;;  %v540_v32 = vrot.slane %v276_v0, %v1639_v52 }
 0x13f   : > { %v1671_v33 = vpop.permute.xlu0 %470 }
 0x142   : > { %v407_v2 = vpop.permute.xlu1 %406 }
 0x143   : > { %v414_v4 = vmul.f32 %v412_v1, %v407_v2 }
 0x144   : > { %v515_v37 = vpop.permute.xlu0 %514 }
 0x145   : > { %v1659_v7 = vadd.f32 %v414_v4, %v352_v3  ;;  %v307_v3 = vmul.f32 %v1616_v39, %v1599_v26  ;;  %v293_v4 = vmul.f32 %v292_v58, %v1613_v38  ;;  %v321_v26 = vmul.f32 %v320_v12, %v1637_v51 }
 0x146   : > { %v381_v38 = vmul.f32 %v380_v10, %v1629_v48  ;;  %v1701_v39 = vrot.slane %v1649_v60, %v1657_v6 }
 0x147   : > { %v419_v9 = vpop.permute.xlu1 %418  ;;  %v367_v15 = vadd.f32 %v365_v55, %v307_v3  ;;  %v351_v58 = vadd.f32 %v349_v11, %v293_v4  ;;  %v461_v3 = vmul.f32 %v1691_v40, %v451_v30  ;;  %v588_v4 = vrot.slane %v276_v0, %v1623_v45 }
 0x148   : > { %v1673_v42 = vpop.permute.xlu0 %518  ;;  %v429_v14 = vmul.f32 %v428_v56, %v419_v9  ;;  %v383_v55 = vadd.f32 %v381_v38, %v321_v26  ;;  %v620_v11 = vrot.slane %v276_v0, %v1610_v36  ;;  %v652_v38 = vrot.slane %v276_v0, %v1627_v47 }
 0x14a   : > { %v431_v59 = vadd.f32 %v429_v14, %v367_v15  ;;  %v430_v15 = vmul.f32 %v428_v56, %v423_v29  ;;  %v478_v56 = vmul.f32 %v476_v5, %v1671_v33 }
 0x14c   : > { %v435_v13 = vpop.permute.xlu1 %434  ;;  %v432_v29 = vadd.f32 %v430_v15, %v1625_v46  ;;  %v480_v33 = vadd.f32 %v478_v56, %v1659_v7 }
 0x14d   : > { %v547_v44 = vpop.permute.xlu0 %546 }
 0x150   : > { %v439_v17 = vpop.permute.xlu1 %438 }
 0x151   : > { %v446_v19 = vmul.f32 %v444_v16, %v439_v17  ;;  %v413_v17 = vmul.f32 %v412_v1, %v403_v24  ;;  %v604_v1 = vrot.slane %v276_v0, %v1641_v53  ;;  %v1706_v24 = vrot.slane %v276_v0, %v319_v8 }
 0x153   : > { %v1663_v20 = vadd.f32 %v446_v19, %v384_v18  ;;  %v556_v18 = vrot.slane %v276_v0, %v1608_v34  ;;  %v535_v19 = vpop.permute.xlu0 %534  ;;  %v524_v34 = vrot.slane %v1649_v60, %v1627_v47  ;;  %v415_v51 = vadd.f32 %v413_v17, %v351_v58 }
 0x155   : > { %1844 = vst [vmem:[#allocation23_spill] sm:$0xff] %v1663_v20  ;;  %v1665_v21 = vpop.permute.xlu1 %454  ;;  %v557_v48 = vmul.f32 %v556_v18, %v547_v44  ;;  %v636_v44 = vrot.slane %v276_v0, %v1657_v6  ;;  %v542_v0 = vmul.f32 %v540_v32, %v535_v19 }
 0x157   : > { %v1708_v10 = vpop.permute.xlu0 %582 }
 0x15a   : > { %v467_v22 = vpop.permute.xlu1 %466 }
 0x15b   : > { %v477_v9 = vmul.f32 %v476_v5, %v467_v22 }
 0x15c   : > { %v627_v17 = vpop.permute.xlu0 %626 }
 0x15d   : > { %v479_v53 = vadd.f32 %v477_v9, %v415_v51  ;;  %v637_v6 = vmul.f32 %v636_v44, %v627_v17 }
 0x15f   : > { %v483_v23 = vpop.permute.xlu1 %482 }
 0x160   : > { %v493_v54 = vmul.f32 %v492_v63, %v483_v23  ;;  %v445_v23 = vmul.f32 %v444_v16, %v435_v13  ;;  %v525_v13 = vmul.f32 %v524_v34, %v515_v37 }
 0x162   : > { %v495_v52 = vadd.f32 %v493_v54, %v431_v59  ;;  %v447_v8 = vadd.f32 %v445_v23, %v383_v55  ;;  %v615_v23 = vpop.permute.xlu0 %614 }
 0x164   : > { %v499_v25 = vpop.permute.xlu1 %498  ;;  %v559_v54 = vadd.f32 %v557_v48, %v495_v52  ;;  %v663_v52 = vld [vmem:[%s1541_s12] sm:$0xf] }
 0x165   : > { %v509_v22 = vmul.f32 %v1701_v39, %v499_v25  ;;  %v463_v25 = vadd.f32 %v461_v3, %v1645_v57 }
 0x167   : > { %v511_v26 = vadd.f32 %v509_v22, %v447_v8  ;;  %v676_v22 = vrot.slane %v663_v52, 4 }
 0x169   : > { %v1667_v27 = vpop.permute.xlu1 %486 }
 0x16a   : > { %v494_v36 = vmul.f32 %v492_v63, %v1667_v27  ;;  %v336_v27 = vmul.f32 %v1632_v49, %v1653_v62  ;;  %v398_v63 = vmul.f32 %v1635_v50, %v1651_v61  ;;  %v544_v49 = vadd.f32 %v542_v0, %v480_v33 }
 0x16b   : > { %v526_v61 = vmul.f32 %v524_v34, %v1673_v42  ;;  %v1845_v42 = vld [vmem:[#allocation23_spill] sm:$0xff] }
 0x16c   : > { %v496_v51 = vadd.f32 %v494_v36, %v432_v29  ;;  %v400_v3 = vadd.f32 %v398_v63, %v336_v27 }
 0x16e   : > { %v1669_v31 = vpop.permute.xlu1 %502 }
 0x16f   : > { %v510_v7 = vmul.f32 %v1701_v39, %v1669_v31 }
 0x171   : > { %v512_v34 = vadd.f32 %v510_v7, %v1845_v42 }
 0x173   : > { %v531_v28 = vpop.permute.xlu1 %530 }
 0x174   : > { %v541_v12 = vmul.f32 %v540_v32, %v531_v28 }
 0x176   : > { %v543_v28 = vadd.f32 %v541_v12, %v479_v53 }
 0x178   : > { %v563_v35 = vpop.permute.xlu1 %562 }
 0x179   : > { %v573_v16 = vmul.f32 %v1706_v24, %v563_v35  ;;  %v527_v35 = vadd.f32 %v525_v13, %v463_v25 }
 0x17b   : > { %v575_v58 = vadd.f32 %v573_v16, %v511_v26 }
 0x17d   : > { %v579_v41 = vpop.permute.xlu1 %578  ;;  %v639_v46 = vadd.f32 %v637_v6, %v575_v58 }
 0x17e   : > { %v589_v45 = vmul.f32 %v588_v4, %v579_v41 }
 0x180   : > { %v591_v41 = vadd.f32 %v589_v45, %v527_v35 }
 0x182   : > { %v1675_v43 = vpop.permute.xlu1 %550 }
 0x183   : > { %v558_v59 = vmul.f32 %v556_v18, %v1675_v43  ;;  %v462_v43 = vmul.f32 %v1691_v40, %v1665_v21  ;;  %v622_v18 = vmul.f32 %v620_v11, %v615_v23 }
 0x185   : > { %v560_v5 = vadd.f32 %v558_v59, %v496_v51  ;;  %v464_v19 = vadd.f32 %v462_v43, %v400_v3 }
 0x187   : > { %v1683_v2 = vpop.permute.xlu1 %566  ;;  %v624_v32 = vadd.f32 %v622_v18, %v560_v5 }
 0x188   : > { %v574_v13 = vmul.f32 %v1706_v24, %v1683_v2 }
 0x18c   : > { %v595_v20 = vpop.permute.xlu1 %594 }
 0x18d   : > { %v605_v60 = vmul.f32 %v604_v1, %v595_v20 }
 0x18f   : > { %v607_v20 = vadd.f32 %v605_v60, %v543_v28  ;;  %v528_v60 = vadd.f32 %v526_v61, %v464_v19  ;;  %v576_v28 = vadd.f32 %v574_v13, %v512_v34 }
 0x191   : > { %v611_v14 = vpop.permute.xlu1 %610 }
 0x192   : > { %v621_v30 = vmul.f32 %v620_v11, %v611_v14 }
 0x194   : > { %v623_v37 = vadd.f32 %v621_v30, %v559_v54 }
 0x196   : > { %v657_v9 = vadd.f32 %v623_v37, %v607_v20  ;;  %v643_v57 = vpop.permute.xlu1 %642 }
 0x197   : > { %v653_v47 = vmul.f32 %v652_v38, %v643_v57 }
 0x199   : > { %v655_v48 = vadd.f32 %v653_v47, %v591_v41 }
 0x19b   : > { %v659_v12 = vadd.f32 %v655_v48, %v639_v46  ;;  %v599_v55 = vpop.permute.xlu1 %598 }
 0x19c   : > { %v606_v62 = vmul.f32 %v604_v1, %v599_v55  ;;  %v590_v1 = vmul.f32 %v588_v4, %v1708_v10 }
 0x19d   : > { %v661_v50 = vadd.f32 %v659_v12, %v657_v9 }
 0x19e   : > { %v608_v53 = vadd.f32 %v606_v62, %v544_v49  ;;  %v592_v15 = vadd.f32 %v590_v1, %v528_v60 }
 0x19f   : > { %711 = vst [vmem:[%s1732_s10] sm:$0xff] %v661_v50  ;;  %v678_v11 = vmul.f32 %v676_v22, %v661_v50  ;;  %v664_v54 = vmul.f32 %v663_v52, %v661_v50 }
 0x1a0   : > { %v658_v21 = vadd.f32 %v624_v32, %v608_v53  ;;  %v631_v40 = vpop.permute.xlu1 %630 }
 0x1a1   : > { %v638_v8 = vmul.f32 %v636_v44, %v631_v40  ;;  %v680_v16 = vrot.slane %v678_v11, 1  ;;  %v666_v26 = vrot.slane %v664_v54, 1  ;;  %v683_v45 = vrot.slane %v678_v11, 2 }
 0x1a2   : > { %v686_v44 = vrot.slane %v678_v11, 3  ;;  %v669_v35 = vrot.slane %v664_v54, 2  ;;  %v672_v47 = vrot.slane %v664_v54, 3 }
 0x1a3   : > { %v640_v31 = vadd.f32 %v638_v8, %v576_v28  ;;  %v682_v30 = vadd.f32 %v680_v16, %v678_v11  ;;  %v668_v24 = vadd.f32 %v666_v26, %v664_v54 }
 0x1a5   : > { %v647_v14 = vpop.permute.xlu1 %646  ;;  %v685_v4 = vadd.f32 %v683_v45, %v682_v30  ;;  %v671_v59 = vadd.f32 %v669_v35, %v668_v24 }
 0x1a6   : > { %v654_v17 = vmul.f32 %v652_v38, %v647_v14 }
 0x1a7   : > { %v688_v58 = vadd.f32 %v686_v44, %v685_v4  ;;  %v674_v51 = vadd.f32 %v672_v47, %v671_v59 }
 0x1a8   : > { %v656_v39 = vadd.f32 %v654_v17, %v592_v15 }
 0x1a9   : > { %v714_v27 = vrot.slane %v688_v58, 3 }
 0x1aa   : > { %v660_v25 = vadd.f32 %v656_v39, %v640_v31 }
 0x1ab   : > { %v723_v33 = vsel %vm722_vm0, %v674_v51, %v714_v27 }
 0x1ac   : > { %v662_v10 = vadd.f32 %v660_v25, %v658_v21 }
 0x1ae   : > { %v689_v36 = vmul.f32 %v663_v52, %v662_v10  ;;  %v700_v2 = vmul.f32 %v676_v22, %v662_v10  ;;  %712 = vst [vmem:[%s1732_s10 + $0x8] sm:$0xff] %v662_v10 }
 0x1b0   : > { %v691_v20 = vrot.slane %v689_v36, 1  ;;  %v702_v37 = vrot.slane %v700_v2, 1  ;;  %v694_v6 = vrot.slane %v689_v36, 2  ;;  %v705_v56 = vrot.slane %v700_v2, 2 }
 0x1b1   : > { %v697_v57 = vrot.slane %v689_v36, 3  ;;  %v708_v23 = vrot.slane %v700_v2, 3 }
 0x1b2   : > { %v693_v38 = vadd.f32 %v691_v20, %v689_v36  ;;  %v704_v29 = vadd.f32 %v702_v37, %v700_v2 }
 0x1b4   : > { %v696_v9 = vadd.f32 %v694_v6, %v693_v38  ;;  %v707_v41 = vadd.f32 %v705_v56, %v704_v29 }
 0x1b6   : > { %v699_v63 = vadd.f32 %v697_v57, %v696_v9  ;;  %v710_v0 = vadd.f32 %v708_v23, %v707_v41 }
 0x1b8   : > { %v717_v46 = vrot.slane %v699_v63, 6  ;;  %v720_v48 = vrot.slane %v710_v0, 1 }
 0x1ba   : > { %v725_v43 = vsel %vm724_vm1, %v723_v33, %v717_v46 }
 0x1bb   : > { %v727_v5 = vsel %vm726_vm2, %v725_v43, %v720_v48 }
 0x1bc   : > { %728 = vst [vmem:[%s1732_s10 + $0x10] sm:$0xf] %v727_v5 }
 0x1bd   : > { %1145 = shalt.err (!%p1142_p2)
}
 0x1be   : > { %s1146_s17 = scalar_lea.hbm %s1749_s2, 384  ;;  %s1150_s1 = scalar_lea.hbm %s1806_s4, 768 }
 0x1bf   : > { %p1147_p3 = scmp.ne.s32.totalorder %s1749_s2, %s1146_s17  ;;  %p1151_p4 = scmp.lt.s32.totalorder %s1749_s2, %s1806_s4 }
 0x1c0   : > { %p1152_p1 = scmp.lt.s32.totalorder %s1150_s1, %s1146_s17 }
 0x1c1   : > { %p1148_p0 = pnand %p1147_p3, %p1846_p12 }
 0x1c2   : > { %p1153_p5 = por %p1152_p1, %p1151_p4 }
 0x1c3   : > { %p1149_p8 = pneg %p1148_p0 }
 0x1c5   : > { %p1154_p11 = pnand %p1153_p5, %p1149_p8 }
 0x1c7   : > { %1157 = shalt.err (!%p1154_p11)
}
 0x1c8   : > { %s1265_s12 = smov 128   ;;  %s1266_s6 = smov 256  }
 0x1c9   : > { %s1267_s28 = smov 8  }
 0x1ca   : > { %889 = dma.vmem_to_hbm [thread:$0]  (%p1846_p12), %s1744_s18, 384, %s1749_s2, %s730_s24, %s1265_s12, %s1266_s6, %s1267_s28  }
 0x1cb PF: > { %s1847_s8 = sld [smem:[#allocation21_spill]]  ;;  %s757_s5 = sand.u32 1, %s1218_s21  }
 0x1cc   : > { %p1849_p6 = scmp.ge.s32.totalorder %s1230_s23, 2  ;;  %s758_s10 = scalar_lea.sflag [#allocation6], %s757_s5 }
 0x1d1   : > { %p1848_p13 = scmp.ne.s32.totalorder %s1847_s8, 0 }
 0x1d3   : > { %p904_p10 = pnand %p1849_p6, %p1848_p13 }
 0x1d5   : > { %p905_p7 = pneg %p904_p10 }
 0x1d7   : > { %1201 = dma.done.wait (%p905_p7), %s758_s10, 384  }
 0x1d8   : > { %1203 = vsyncadd (%p905_p7), %s758_s10, 4294966912  ;;  %s1850_s23 = sld [smem:[#allocation19_spill]]  ;;  %s1854_s18 = smov %s1210_s19 }
 0x1d9   : > { %s1851_s16 = sld [smem:[#allocation22_spill]]  ;;  %s1855_s19 = smov %s1214_s20 }
 0x1da   : > { %s1852_s11 = sld [smem:[#allocation18_spill]]  ;;  %s1857_s21 = smov %s1222_s22 }
 0x1db   : > { %s1853_s0 = sld [smem:[#allocation20_spill]] }
 0x1de   : > { %p24_p12 = scmp.ge.s32.totalorder %s1850_s23, 4  }
 0x1df   : > { %s1856_s20 = smov %s1851_s16 }
 0x1e0   : > { %s1858_s22 = smov %s1852_s11  ;;  %26 = sbr.rel (!%p24_p12) target bundleno = 16 (0x10), region = 101 }
 0x1e5   :  { %763 = vsyncpa [#allocation5], 1 }
 0x1e6   :  { %765 = vsyncpa [#allocation5 + $0x1], 1 }
 0x1e7   :  { %766 = vsyncpa [#allocation8], 1 }
 0x1e8   :  { %768 = vsyncpa [#allocation8 + $0x1], 1 }
 0x1e9   :  { %769 = vsyncpa [#allocation6], 1 }
 0x1ea   :  { %771 = vsyncpa [#allocation6 + $0x1], 1 }

</bundles_post_ra>
